<compile_context>
chip_gen: v6e
topology: v6e:2x2x1
jax: 0.10.0
libtpu: 0.0.40
codegen_flags: <defaults>
</compile_context>

<pallas_src>
import functools

import jax
import jax.numpy as jnp
from jax.experimental import pallas as pl
from jax.experimental.pallas import tpu as pltpu


def _round_up(x, n):
    return ((x + n - 1) // n) * n


def _pick_tile(total, target, granule):
    """Largest multiple of `granule` dividing `total`, <= target; else `total`."""
    best = None
    t = granule
    while t <= min(total, target):
        if total % t == 0:
            best = t
        t += granule
    return best if best is not None else total


def _choose_hidden_tile(hidden, target):
    """Hidden tile size + (possibly padded) hidden extent."""
    t = _pick_tile(hidden, target, 128)
    if t <= target:
        return t, hidden
    # No 128-multiple divisor of hidden <= target: pad hidden up to a multiple
    # of the target tile instead of loading the whole weight as one block.
    th = max(128, (target // 128) * 128)
    return th, _round_up(hidden, th)


@functools.lru_cache(maxsize=1)
def _vmem_capacity_bytes():
    try:
        info = pltpu.get_tpu_info()
        cap = getattr(info, "vmem_capacity_bytes", None)
        if cap:
            return int(cap)
    except Exception:
        pass
    return 64 * 1024 * 1024  # conservative fallback (v7x-sized)


# --------------------------------------------------------------------------
# One-time weight preparation (run once per model, OUTSIDE the hot path).
# --------------------------------------------------------------------------
def prepare_ffn_weights(w1_t, w3_t, w2_t, *, th_target=256,
                        compute_dtype=jnp.bfloat16):
    """w1_t, w3_t: (dim, hidden); w2_t: (hidden, dim)  ->  (w13_blocks, w2c).

    w13_blocks: (n_k, dim, 2*th) bf16, block k = [w1_k | w3_k], contiguous per tile.
    w2c       : (hidden_pad, dim) bf16 (rows zero-padded if hidden was padded).
    """
    dim, hidden = w1_t.shape
    assert w3_t.shape == (dim, hidden) and w2_t.shape == (hidden, dim)

    th, hidden_pad = _choose_hidden_tile(hidden, th_target)
    n_k = hidden_pad // th
    pad = hidden_pad - hidden

    w1c = w1_t.astype(compute_dtype)
    w3c = w3_t.astype(compute_dtype)
    w2c = w2_t.astype(compute_dtype)
    if pad:
        # Padded hidden columns produce h == 0 (silu(0)*0), so zero rows of w2
        # contribute nothing: exact.
        w1c = jnp.pad(w1c, ((0, 0), (0, pad)))
        w3c = jnp.pad(w3c, ((0, 0), (0, pad)))
        w2c = jnp.pad(w2c, ((0, pad), (0, 0)))

    w1b = w1c.reshape(dim, n_k, th).transpose(1, 0, 2)   # (n_k, dim, th)
    w3b = w3c.reshape(dim, n_k, th).transpose(1, 0, 2)   # (n_k, dim, th)
    w13 = jnp.concatenate([w1b, w3b], axis=2)            # (n_k, dim, 2*th)
    return w13, w2c


# --------------------------------------------------------------------------
# Kernel
# --------------------------------------------------------------------------
def _ffn_kernel(x_ref, w13_ref, w2_ref, o_ref, acc_ref, *, th):
    # x_ref  : (tm, dim)      bf16 row-tile (resident across k)
    # w13_ref: (dim, 2*th)    bf16 fused [w1_k | w3_k] hidden-tile (streamed)
    # w2_ref : (th, dim)      bf16 down-projection hidden-tile (streamed)
    # o_ref  : (tm, dim)      output row-tile (written on last k)
    # acc_ref: (tm, dim) f32  VMEM accumulator (resident across k)
    k = pl.program_id(1)

    @pl.when(k == 0)
    def _():
        acc_ref[...] = jnp.zeros_like(acc_ref)

    x = x_ref[...]

    # Fused gate+up projection on the MXU, f32 accumulation: (tm, 2*th).
    h13 = jnp.dot(x, w13_ref[...], preferred_element_type=jnp.float32)
    h1 = h13[:, :th]
    h3 = h13[:, th:]

    # SiLU(h1) * h3 in f32 (VPU + EUP).
    h = (h1 * jax.nn.sigmoid(h1)) * h3

    # Partial down projection, accumulated in f32.
    acc_ref[...] += jnp.dot(h.astype(w2_ref.dtype), w2_ref[...],
                            preferred_element_type=jnp.float32)

    @pl.when(k == pl.num_programs(1) - 1)
    def _():
        o_ref[...] = acc_ref[...].astype(o_ref.dtype)


# --------------------------------------------------------------------------
# Per-call wrapper (hot path: only x reshape/pad/cast + pallas_call)
# --------------------------------------------------------------------------
@functools.partial(jax.jit, static_argnames=("tm", "compute_dtype"))
def feed_forward(x, w13, w2c, *, tm=None, compute_dtype=jnp.bfloat16):
    """x: (batch, seq, dim) -> (batch, seq, dim). Weights from prepare_ffn_weights."""
    batch, seq, dim = x.shape
    n_k, dim_w, two_th = w13.shape
    th = two_th // 2
    hidden_pad = n_k * th
    assert dim_w == dim
    assert w2c.shape == (hidden_pad, dim)

    m = batch * seq
    out_dtype = x.dtype
    comp_isz = jnp.dtype(compute_dtype).itemsize
    out_isz = jnp.dtype(out_dtype).itemsize

    # --- generation-aware limits -------------------------------------------
    cap = _vmem_capacity_bytes()
    small_vmem = cap <= 80 * 1024 * 1024          # v7x-class (64 MiB / 2 TCs)
    tm_target = tm if tm is not None else (512 if small_vmem else 1024)
    if small_vmem:
        vmem_limit = int(cap * 0.75)              # ~48 MiB: headroom for scratch
    else:
        vmem_limit = min(cap - (16 << 20), 110 << 20)

    # --- row tile sizing under an explicit VMEM budget ----------------------
    # double-buffered weight tiles (w13 + w2):
    w_buf = 2 * (dim * 2 * th + th * dim) * comp_isz
    # per-row: f32 acc + double-buffered x block + double-buffered out block
    per_row = dim * (4 + 2 * comp_isz + 2 * out_isz)
    tm_cap = max(16, ((vmem_limit - w_buf - (4 << 20)) // per_row) // 16 * 16)

    tm_eff = min(tm_target, tm_cap, _round_up(m, 16))
    tm_eff = max(16, (tm_eff // 16) * 16)

    # v7x (2 TensorCores): prefer an even number of row tiles for the parallel axis.
    n_i = -(-m // tm_eff)
    if small_vmem and n_i > 1 and n_i % 2 == 1 and tm_eff >= 32:
        tm_half = max(16, ((tm_eff // 2) // 16) * 16)
        if (-(-m // tm_half)) % 2 == 0:
            tm_eff = tm_half

    m_pad = _round_up(m, tm_eff)

    # --- operand prep (activations only) ------------------------------------
    x2d = x.reshape(m, dim).astype(compute_dtype)
    if m_pad != m:
        x2d = jnp.pad(x2d, ((0, m_pad - m), (0, 0)))

    grid = (m_pad // tm_eff, n_k)

    cost = pl.CostEstimate(
        flops=6 * m_pad * dim * hidden_pad,
        transcendentals=m_pad * hidden_pad,
        bytes_accessed=(m_pad * dim * comp_isz                         # x
                        + grid[0] * (dim * 2 * hidden_pad * comp_isz   # w13 per row-tile
                                     + hidden_pad * dim * comp_isz)    # w2 per row-tile
                        + m_pad * dim * out_isz))                      # out

    out2d = pl.pallas_call(
        functools.partial(_ffn_kernel, th=th),
        out_shape=jax.ShapeDtypeStruct((m_pad, dim), out_dtype),
        grid_spec=pltpu.PrefetchScalarGridSpec(
            num_scalar_prefetch=0,
            grid=grid,
            in_specs=[
                pl.BlockSpec((tm_eff, dim), lambda i, k: (i, 0)),            # x rows
                pl.BlockSpec((pl.Squeezed(), dim, 2 * th),
                             lambda i, k: (k, 0, 0)),                        # fused w1|w3 tile
                pl.BlockSpec((th, dim), lambda i, k: (k, 0)),                # w2 tile
            ],
            out_specs=pl.BlockSpec((tm_eff, dim), lambda i, k: (i, 0)),
            scratch_shapes=[pltpu.VMEM((tm_eff, dim), jnp.float32)],
        ),
        compiler_params=pltpu.CompilerParams(
            dimension_semantics=("parallel", "arbitrary"),
            vmem_limit_bytes=int(vmem_limit),
        ),
        cost_estimate=cost,
    )(x2d, w13, w2c)

    if m_pad != m:
        out2d = out2d[:m]
    return out2d.reshape(batch, seq, dim)


# --------------------------------------------------------------------------
# Test harness
# --------------------------------------------------------------------------
def _init_params(key, dim, hidden_dim, multiple_of):
    # Reproduce the hidden_dim=None branch of the PyTorch __init__.
    if hidden_dim is None:
        hidden_dim = 4 * dim
        hidden_dim = int(2 * hidden_dim / 3)
        hidden_dim = multiple_of * ((hidden_dim + multiple_of - 1) // multiple_of)

    k1, k2, k3 = jax.random.split(key, 3)

    # nn.Linear default init: U(-1/sqrt(fan_in), 1/sqrt(fan_in)).
    def lin_weight(k, fan_in, fan_out):
        bound = 1.0 / jnp.sqrt(fan_in)
        # torch weight shape is (fan_out, fan_in); we store the transpose.
        return jax.random.uniform(k, (fan_in, fan_out), jnp.float32,
                                  minval=-bound, maxval=bound)

    w1_t = lin_weight(k1, dim, hidden_dim)        # (dim, hidden)
    w2_t = lin_weight(k2, hidden_dim, dim)        # (hidden, dim)
    w3_t = lin_weight(k3, dim, hidden_dim)        # (dim, hidden)
    return w1_t, w2_t, w3_t, hidden_dim


def _reference(x, w1_t, w3_t, w2_t, compute_dtype=jnp.bfloat16):
    # Same numeric recipe as the kernel (bf16 MXU operands, f32 accumulation).
    xb = x.astype(compute_dtype)
    h1 = jnp.dot(xb, w1_t.astype(compute_dtype),
                 preferred_element_type=jnp.float32)
    h3 = jnp.dot(xb, w3_t.astype(compute_dtype),
                 preferred_element_type=jnp.float32)
    h = (h1 * jax.nn.sigmoid(h1)) * h3
    out = jnp.dot(h.astype(compute_dtype), w2_t.astype(compute_dtype),
                  preferred_element_type=jnp.float32)
    return out.astype(x.dtype)


if __name__ == "__main__":
    dim = 128
    multiple_of = 128     # -> hidden = 384, exercises 3 hidden-tiles of 128
    batch, seq = 2, 8

    key = jax.random.PRNGKey(0)
    kx, kp = jax.random.split(key)

    w1_t, w2_t, w3_t, hidden_dim = _init_params(kp, dim, None, multiple_of)
    x = jax.random.normal(kx, (batch, seq, dim), jnp.float32)

    # One-time weight prep (fuse, cast, block-contiguous layout).
    w13, w2c = prepare_ffn_weights(w1_t, w3_t, w2_t, th_target=256)
    w13, w2c = jax.block_until_ready((w13, w2c))

    out = feed_forward(x, w13, w2c)
    out = jax.block_until_ready(out)

    ref = _reference(x, w1_t, w3_t, w2_t)
    assert out.shape == (batch, seq, dim)
    assert jnp.allclose(out, ref, atol=2e-2, rtol=2e-2), (
        float(jnp.max(jnp.abs(out - ref))))

    print("KERNEL_OK")
</pallas_src>

<mosaic_0001>
module attributes {stable_mosaic.version = 11 : i64} {
  func.func @_ffn_kernel(%arg0: i32, %arg1: i32, %arg2: memref<16x128xbf16, #tpu.memory_space<vmem>>, %arg3: memref<1x128x256xbf16, #tpu.memory_space<vmem>>, %arg4: memref<128x128xbf16, #tpu.memory_space<vmem>>, %arg5: memref<16x128xf32, #tpu.memory_space<vmem>>, %arg6: memref<16x128xf32, #tpu.memory_space<vmem>>) attributes {dimension_semantics = [#tpu.dimension_semantics<parallel>, #tpu.dimension_semantics<arbitrary>], iteration_bounds = array<i64: 1, 3>, scalar_prefetch = 0 : i64, scratch_operands = 1 : i64, tpu.core_type = #tpu.core_type<tc>, window_params = [{transform_indices = @transform_0, window_bounds = array<i64: 16, 128>}, {transform_indices = @transform_1, window_bounds = array<i64: 1, 128, 256>}, {transform_indices = @transform_2, window_bounds = array<i64: 128, 128>}, {transform_indices = @transform_3, window_bounds = array<i64: 16, 128>}]} {
    %c0_i32 = arith.constant 0 : i32
    %0 = arith.cmpi eq, %arg1, %c0_i32 : i32
    %1 = arith.extui %0 : i1 to i32
    %c0_i32_0 = arith.constant 0 : i32
    %2 = arith.cmpi ne, %1, %c0_i32_0 : i32
    scf.if %2 {
      %cst_14 = arith.constant 0.000000e+00 : f32
      %25 = vector.broadcast %cst_14 : f32 to vector<16x128xf32>
      %c0_15 = arith.constant 0 : index
      %c0_16 = arith.constant 0 : index
      %26 = vector.load %arg6[%c0_15, %c0_16] : memref<16x128xf32, #tpu.memory_space<vmem>>, vector<16x128xf32>
      tpu.vector_store %arg6[%c0_15, %c0_16], %25 {strides = array<i32>} : memref<16x128xf32, #tpu.memory_space<vmem>>, vector<16x128xf32>,
    } else {
    }
    %c0 = arith.constant 0 : index
    %c0_1 = arith.constant 0 : index
    %3 = vector.load %arg2[%c0, %c0_1] : memref<16x128xbf16, #tpu.memory_space<vmem>>, vector<16x128xbf16>
    %c0_2 = arith.constant 0 : index
    %c0_3 = arith.constant 0 : index
    %c0_4 = arith.constant 0 : index
    %4 = vector.load %arg3[%c0_2, %c0_3, %c0_4] : memref<1x128x256xbf16, #tpu.memory_space<vmem>>, vector<1x128x256xbf16>
    %5 = vector.shape_cast %4 : vector<1x128x256xbf16> to vector<128x256xbf16>
    %cst = arith.constant dense<0.000000e+00> : vector<16x256xf32>
    %6 = tpu.matmul %3, %5, %cst {dimension_numbers = #tpu.dot_dimension_numbers<[1], [0], [0], [1], [0, 0, 1, 1], [], []>} : vector<16x128xbf16>, vector<128x256xbf16>, vector<16x256xf32> -> vector<16x256xf32>
    %7 = vector.extract_strided_slice %6 {offsets = [0, 0], sizes = [16, 128], strides = [1, 1]} : vector<16x256xf32> to vector<16x128xf32>
    %8 = vector.extract_strided_slice %6 {offsets = [0, 128], sizes = [16, 128], strides = [1, 1]} : vector<16x256xf32> to vector<16x128xf32>
    %9 = arith.negf %7 : vector<16x128xf32>
    %10 = math.exp %9 : vector<16x128xf32>
    %cst_5 = arith.constant 1.000000e+00 : f32
    %11 = vector.broadcast %cst_5 : f32 to vector<16x128xf32>
    %12 = arith.addf %11, %10 : vector<16x128xf32>
    %13 = arith.divf %11, %12 : vector<16x128xf32>
    %14 = arith.mulf %7, %13 : vector<16x128xf32>
    %15 = arith.mulf %14, %8 : vector<16x128xf32>
    %c0_6 = arith.constant 0 : index
    %c0_7 = arith.constant 0 : index
    %16 = vector.load %arg6[%c0_6, %c0_7] : memref<16x128xf32, #tpu.memory_space<vmem>>, vector<16x128xf32>
    %17 = arith.truncf %15 : vector<16x128xf32> to vector<16x128xbf16>
    %c0_8 = arith.constant 0 : index
    %c0_9 = arith.constant 0 : index
    %18 = vector.load %arg4[%c0_8, %c0_9] : memref<128x128xbf16, #tpu.memory_space<vmem>>, vector<128x128xbf16>
    %cst_10 = arith.constant dense<0.000000e+00> : vector<16x128xf32>
    %19 = tpu.matmul %17, %18, %cst_10 {dimension_numbers = #tpu.dot_dimension_numbers<[1], [0], [0], [1], [0, 0, 1, 1], [], []>} : vector<16x128xbf16>, vector<128x128xbf16>, vector<16x128xf32> -> vector<16x128xf32>
    %20 = arith.addf %16, %19 : vector<16x128xf32>
    %c0_11 = arith.constant 0 : index
    %c0_12 = arith.constant 0 : index
    %21 = vector.load %arg6[%c0_11, %c0_12] : memref<16x128xf32, #tpu.memory_space<vmem>>, vector<16x128xf32>
    tpu.vector_store %arg6[%c0_11, %c0_12], %20 {strides = array<i32>} : memref<16x128xf32, #tpu.memory_space<vmem>>, vector<16x128xf32>,
    %c2_i32 = arith.constant 2 : i32
    %22 = arith.cmpi eq, %arg1, %c2_i32 : i32
    %23 = arith.extui %22 : i1 to i32
    %c0_i32_13 = arith.constant 0 : i32
    %24 = arith.cmpi ne, %23, %c0_i32_13 : i32
    scf.if %24 {
      %c0_14 = arith.constant 0 : index
      %c0_15 = arith.constant 0 : index
      %25 = vector.load %arg6[%c0_14, %c0_15] : memref<16x128xf32, #tpu.memory_space<vmem>>, vector<16x128xf32>
      %c0_16 = arith.constant 0 : index
      %c0_17 = arith.constant 0 : index
      %26 = vector.load %arg5[%c0_16, %c0_17] : memref<16x128xf32, #tpu.memory_space<vmem>>, vector<16x128xf32>
      tpu.vector_store %arg5[%c0_16, %c0_17], %25 {strides = array<i32>} : memref<16x128xf32, #tpu.memory_space<vmem>>, vector<16x128xf32>,
    } else {
    }
    return
  }
  func.func @transform_0(%arg0: i32, %arg1: i32) -> (i32, i32) {
    %c0_i32 = arith.constant 0 : i32
    %c0_i32_0 = arith.constant 0 : i32
    return %arg0, %c0_i32 : i32, i32
  }
  func.func @transform_1(%arg0: i32, %arg1: i32) -> (i32, i32, i32) {
    %c0_i32 = arith.constant 0 : i32
    %c0_i32_0 = arith.constant 0 : i32
    %c0_i32_1 = arith.constant 0 : i32
    return %arg1, %c0_i32, %c0_i32_0 : i32, i32, i32
  }
  func.func @transform_2(%arg0: i32, %arg1: i32) -> (i32, i32) {
    %c0_i32 = arith.constant 0 : i32
    %c0_i32_0 = arith.constant 0 : i32
    return %arg1, %c0_i32 : i32, i32
  }
  func.func @transform_3(%arg0: i32, %arg1: i32) -> (i32, i32) {
    %c0_i32 = arith.constant 0 : i32
    %c0_i32_0 = arith.constant 0 : i32
    return %arg0, %c0_i32 : i32, i32
  }
}

</mosaic_0001>

<bundles_post_ra>
// kernel: feed_forward.1
= control target key start
LH: loop header
LB: loop body
LE: loop exit
PB: predicated region body
PF: predicated region fallthrough
CT: control target
= control target key end

     0   :  { %8 = vsyncpa [#allocation4], 0  ;;  %s1198_s0 = inlined_call_operand.vmem [shape: bf16[16,128], index: 0, kind: input, shape index: {}]   ;;  %s1199_s1 = inlined_call_operand.hbm [shape: bf16[3,128,256], index: 1, kind: input, shape index: {}]   ;;  %s1200_s2 = inlined_call_operand.hbm [shape: bf16[384,128], index: 2, kind: input, shape index: {}]   ;;  %s1201_s3 = inlined_call_operand.hbm [shape: f32[16,128], index: 3, kind: output, shape index: {}]  }
   0x1   :  { %10 = vsyncpa [#allocation4 + $0x1], 0 }
   0x2   :  { %11 = vsyncpa [#allocation7], 0 }
   0x3   :  { %13 = vsyncpa [#allocation7 + $0x1], 0 }
   0x4   :  { %14 = vsyncpa [#allocation5], 0  ;;  %s1027_s12 = smov 0   ;;  %s1029_s13 = smov 0  }
   0x5   :  { %s1031_s14 = smov 0   ;;  %s1033_s15 = smov 0  }
   0x6   :  { %s1035_s16 = smov 0   ;;  %s1037_s17 = smov 0  }
   0x7 LB: > { %s659_s18 = sadd.s32 4294967295, %s992_s17   ;;  %s29_s19 = sadd.s32 1, %s988_s16  ;;  %s992_s17 = sphi %s1037_s17, %s20_s17   ;;  %s988_s16 = sphi %s1035_s16, %s1211_s16   ;;  %s984_s15 = sphi %s1033_s15, %s1210_s15   ;;  %s980_s14 = sphi %s1031_s14, %s1209_s14   ;;  %s976_s13 = sphi %s1029_s13, %s1208_s13   ;;  %s972_s12 = sphi %s1027_s12, %s1207_s12  }
   0x8   : > { %p30_p0 = scmp.ge.s32.totalorder %s29_s19, 3  ;;  %s65_s20 = sadd.s32 1, %s980_s14 }
   0x9   : > { %p72_p1 = scmp.ne.s32.totalorder %s980_s14, %s976_s13  ;;  %p73_p2 = scmp.eq.s32.totalorder %s992_s17, 0 }
   0xa   : > { %s1213_s19 = smov (%p30_p0, %s29_s19), 0  ;;  %p78_p4 = scmp.ne.s32.totalorder %s976_s13, %s972_s12 }
   0xb   : > { %p1063_p3 = por %p73_p2, %p72_p1  ;;  %s62_s22 = ssub.s32 %s988_s16, %s1213_s19 }
   0xc   : > { %p79_p5 = scmp.eq.s32.totalorder %s659_s18, 0  ;;  %p63_p6 = scmp.eq.s32.totalorder %s62_s22, 0 }
   0xd   : > { %p751_p8 = scmp.lt.s32.totalorder %s992_s17, 3  ;;  %s1081_s25 = sand.u32 1, %s980_s14  }
   0xe   : > { %p1072_p7 = por %p79_p5, %p78_p4  ;;  %s705_s26 = sshll.u32 %s988_s16, 11 }
   0xf   : > { %s1078_s24 = scalar_select %p63_p6, %s980_s14, %s65_s20  }
  0x10   : > { %s663_s27 = sshll.u32 %s1081_s25, 7  ;;  %s173_s30 = scalar_lea.hbm %s1199_s1, %s705_s26 }
  0x11   : > { %s167_s4 = scalar_lea.vmem [#allocation3], %s663_s27  ;;  %p1090_p9 = pnand %p751_p8, %p1063_p3 }
  0x12   : > { %s174_s5 = sshll.u32 %s167_s4, 4  ;;  %s164_s7 = scalar_lea.sflag [#allocation4], %s1081_s25  ;;  %s175_s5 = int_to_ptr.vmem [resolvable:$true] %s174_s5 }
  0x13   : > { %p856_p10 = pneg %p1090_p9  ;;  %s867_s8 = scalar_lea.vmem %s175_s5, 2048 }
  0x14   : > { %p868_p11 = scmp.ne.s32.totalorder %s175_s5, %s867_s8  ;;  %s994_s9 = smov [#allocation3]  }
  0x15   : > { %s872_s10 = sshll.u32 %s994_s9, 4  ;;  %s873_s10 = int_to_ptr.vmem [resolvable:$false] %s872_s10 }
  0x16   : > { %p870_p12 = pnand %p868_p11, %p856_p10  ;;  %s874_s11 = scalar_lea.vmem %s873_s10, 4096 }
  0x17   : > { %p875_p0 = scmp.lt.s32.totalorder %s175_s5, %s873_s10  ;;  %p876_p1 = scmp.lt.s32.totalorder %s874_s11, %s867_s8 }
  0x18   : > { %p871_p13 = pneg %p870_p12 }
  0x19   : > { %p877_p2 = por %p876_p1, %p875_p0 }
  0x1b   : > { %p878_p3 = pnand %p877_p2, %p871_p13 }
  0x1d   : > { %881 = shalt.err (!%p878_p3)
}
  0x1e   : > { %s995_s12 = smov 128   ;;  %s996_s20 = smov 8  }
  0x1f   : > { %747 = dma.hbm_to_vmem [thread:$0]  (!%p1090_p9), %s173_s30, 2048, %s175_s5, %s164_s7, %s995_s12, %s995_s12, %s996_s20  }
  0x20   : > { %p669_p4 = scmp.ge.s32.totalorder %s992_s17, 1  ;;  %p203_p5 = scmp.lt.s32.totalorder %s992_s17, 4 }
  0x21   : > { %s666_s21 = sshll.u32 %s1081_s25, 6  ;;  %s706_s26 = sshll.u32 %s988_s16, 10 }
  0x22   : > { %p1105_p6 = pnand %p669_p4, %p203_p5  ;;  %s188_s27 = scalar_lea.vmem [#allocation6], %s666_s21 }
  0x23   : > { %s195_s28 = sshll.u32 %s188_s27, 4  ;;  %s194_s8 = scalar_lea.hbm %s1200_s2, %s706_s26  ;;  %s196_s28 = int_to_ptr.vmem [resolvable:$true] %s195_s28 }
  0x24   : > { %s185_s9 = scalar_lea.sflag [#allocation7], %s1081_s25  ;;  %s895_s10 = scalar_lea.vmem %s196_s28, 1024 }
  0x25   : > { %p896_p8 = scmp.ne.s32.totalorder %s196_s28, %s895_s10  ;;  %s997_s30 = smov [#allocation6]  }
  0x26   : > { %s900_s5 = sshll.u32 %s997_s30, 4  ;;  %s901_s5 = int_to_ptr.vmem [resolvable:$false] %s900_s5 }
  0x27   : > { %p898_p11 = pnand %p896_p8, %p856_p10  ;;  %s902_s7 = scalar_lea.vmem %s901_s5, 2048 }
  0x28   : > { %p903_p13 = scmp.lt.s32.totalorder %s196_s28, %s901_s5  ;;  %p904_p0 = scmp.lt.s32.totalorder %s902_s7, %s895_s10 }
  0x29   : > { %p899_p12 = pneg %p898_p11 }
  0x2a   : > { %p905_p1 = por %p904_p0, %p903_p13 }
  0x2c   : > { %p906_p2 = pnand %p905_p1, %p899_p12 }
  0x2e   : > { %909 = shalt.err (!%p906_p2)
}
  0x2f   : > { %s998_s11 = smov 64   ;;  %s999_s12 = smov 4  }
  0x30   : > { %750 = dma.hbm_to_vmem [thread:$0]  (!%p1090_p9), %s194_s8, 1024, %s196_s28, %s185_s9, %s998_s11, %s998_s11, %s999_s12  }
  0x31   : > { %207 = sbr.rel (%p1105_p6) target bundleno = 559 (0x22f), region = 32  ;;  %s209_s25 = sand.u32 (!%p1105_p6), 1, %s976_s13  }
  0x32   : > { %s670_s20 = sshll.u32 (!%p1105_p6), %s209_s25, 7  ;;  %s210_s21 = scalar_lea.sflag (!%p1105_p6), [#allocation4], %s209_s25 }
  0x33   : > { %s1122_s26 = scalar_lea.vmem (!%p1105_p6), [#allocation3], %s670_s20 }
  0x36   : > { %959 = dma.done.wait (%p1072_p7), %s210_s21, 2048  }
  0x37   : > { %961 = vsyncadd (%p1072_p7), %s210_s21, 4294965248  ;;  %s671_s27 = sshll.u32 %s209_s25, 6  ;;  %s219_s29 = scalar_lea.sflag [#allocation7], %s209_s25 }
  0x38   : > { %s1128_s6 = scalar_lea.vmem [#allocation6], %s671_s27 }
  0x39   : > { %963 = dma.done.wait (%p1072_p7), %s219_s29, 1024  }
  0x3a   : > { %965 = vsyncadd (%p1072_p7), %s219_s29, 4294966272  ;;  %p672_p9 = scmp.ne.s32.totalorder %s984_s15, 0 }
  0x3c   : > { %262 = sbr.rel (%p672_p9) target bundleno = 67 (0x43), region = 44 }
  0x41   : > { %v1000_v0 = vmov 0.0  }
  0x42   : > { %263 = vst [vmem:[#allocation2] sm:$0xff] %v1000_v0  ;;  %264 = vst [vmem:[#allocation2 + $0x8] sm:$0xff] %v1000_v0 }
  0x43 PF: > { %v813_v1 = vld [vmem:[%s1122_s26 + $0x74] ss:$8 sps:$4 sm:$0xff]   ;;  %v815_v2 = vld [vmem:[%s1122_s26 + $0x70] ss:$8 sps:$4 sm:$0xff]   ;;  %v1001_v3 = vmov 0   ;;  %v1002_v20 = vmov 0.0  }
  0x44   : > { %401 = vmatprep.mubr.bf16.mxu0 %v1001_v3  ;;  %369 = vmatprep.subr.bf16.mxu0 %v813_v1  ;;  %v816_v4 = vld [vmem:[%s1122_s26 + $0x64] ss:$8 sps:$4 sm:$0xff]   ;;  %v818_v5 = vld [vmem:[%s1122_s26 + $0x60] ss:$8 sps:$4 sm:$0xff]   ;;  %v819_v6 = vld [vmem:[%s1122_s26 + $0x54] ss:$8 sps:$4 sm:$0xff]  }
  0x45   : > { %370 = vmatpush1.bf16.msra.mxu0 %v815_v2  ;;  %v821_v7 = vld [vmem:[%s1122_s26 + $0x50] ss:$8 sps:$4 sm:$0xff]   ;;  %v822_v8 = vld [vmem:[%s1122_s26 + $0x44] ss:$8 sps:$4 sm:$0xff]   ;;  %v824_v9 = vld [vmem:[%s1122_s26 + $0x40] ss:$8 sps:$4 sm:$0xff]   ;;  %716 = vmatprep.subr.bf16.mxu1 %v1002_v20 }
  0x46   : > { %371 = vmatprep.subr.bf16.mxu0 %v816_v4  ;;  %v825_v10 = vld [vmem:[%s1122_s26 + $0x34] ss:$8 sps:$4 sm:$0xff]   ;;  %v827_v11 = vld [vmem:[%s1122_s26 + $0x30] ss:$8 sps:$4 sm:$0xff]   ;;  %v828_v12 = vld [vmem:[%s1122_s26 + $0x24] ss:$8 sps:$4 sm:$0xff]  }
  0x47   : > { %v830_v13 = vld [vmem:[%s1122_s26 + $0x20] ss:$8 sps:$4 sm:$0xff]   ;;  %v831_v14 = vld [vmem:[%s1122_s26 + $0x14] ss:$8 sps:$4 sm:$0xff]   ;;  %v833_v15 = vld [vmem:[%s1122_s26 + $0x10] ss:$8 sps:$4 sm:$0xff]  }
  0x48   : > { %v834_v16 = vld [vmem:[%s1122_s26 + $0x4] ss:$8 sps:$4 sm:$0xff]   ;;  %v836_v17 = vld [vmem:[%s1122_s26] ss:$8 sps:$4 sm:$0xff]   ;;  %v837_v18 = vld [vmem:[%s1198_s0] sm:$0xff]   ;;  %vm1003_vm0 = vmmov 0  }
  0x49   : > { %372 = vmatpush1.bf16.msra.mxu0 %v818_v5  ;;  %v838_v19 = vld [vmem:[%s1128_s6 + $0x38] sm:$0xff]   ;;  %v839_v21 = vld [vmem:[%s1128_s6 + $0x30] sm:$0xff]   ;;  %v840_v22 = vld [vmem:[%s1128_s6 + $0x28] sm:$0xff]   ;;  %732 = vmatprep.mubr.msk.bf16.mxu1 %vm1003_vm0, %v1002_v20  ;;  %p700_p7 = scmp.ne.s32.totalorder %s984_s15, 2 }
  0x4a   : > { %373 = vmatprep.subr.bf16.mxu0 %v819_v6  ;;  %717 = vmatpush3.bf16.msra.mxu1 %v838_v19  ;;  %v841_v23 = vld [vmem:[%s1128_s6 + $0x20] sm:$0xff]   ;;  %v842_v24 = vld [vmem:[%s1128_s6 + $0x18] sm:$0xff]   ;;  %v843_v25 = vld [vmem:[%s1128_s6 + $0x10] sm:$0xff]  }
  0x4b   : > { %718 = vmatprep.subr.bf16.mxu1 %v1002_v20  ;;  %v844_v26 = vld [vmem:[%s1128_s6 + $0x8] sm:$0xff]   ;;  %v845_v27 = vld [vmem:[%s1128_s6] sm:$0xff]   ;;  %v428_v45 = vld [vmem:[#allocation2] sm:$0xff] }
  0x4c   : > { %v429_v49 = vld [vmem:[#allocation2 + $0x8] sm:$0xff] }
  0x4d   : > { %374 = vmatpush1.bf16.msra.mxu0 %v821_v7 }
  0x4e   : > { %375 = vmatprep.subr.bf16.mxu0 %v822_v8  ;;  %719 = vmatpush3.bf16.msra.mxu1 %v839_v21 }
  0x4f   : > { %720 = vmatprep.subr.bf16.mxu1 %v1002_v20 }
  0x51   : > { %376 = vmatpush1.bf16.msra.mxu0 %v824_v9 }
  0x52   : > { %377 = vmatprep.subr.bf16.mxu0 %v825_v10  ;;  %721 = vmatpush3.bf16.msra.mxu1 %v840_v22 }
  0x53   : > { %722 = vmatprep.subr.bf16.mxu1 %v1002_v20 }
  0x55   : > { %378 = vmatpush1.bf16.msra.mxu0 %v827_v11 }
  0x56   : > { %379 = vmatprep.subr.bf16.mxu0 %v828_v12  ;;  %723 = vmatpush3.bf16.msra.mxu1 %v841_v23 }
  0x57   : > { %724 = vmatprep.subr.bf16.mxu1 %v1002_v20 }
  0x59   : > { %380 = vmatpush1.bf16.msra.mxu0 %v830_v13 }
  0x5a   : > { %381 = vmatprep.subr.bf16.mxu0 %v831_v14  ;;  %725 = vmatpush3.bf16.msra.mxu1 %v842_v24 }
  0x5b   : > { %726 = vmatprep.subr.bf16.mxu1 %v1002_v20 }
  0x5d   : > { %382 = vmatpush1.bf16.msra.mxu0 %v833_v15 }
  0x5e   : > { %383 = vmatprep.subr.bf16.mxu0 %v834_v16  ;;  %727 = vmatpush3.bf16.msra.mxu1 %v843_v25 }
  0x5f   : > { %728 = vmatprep.subr.bf16.mxu1 %v1002_v20 }
  0x61   : > { %384 = vmatpush1.bf16.msra.mxu0 %v836_v17 }
  0x62   : > { %729 = vmatpush3.bf16.msra.mxu1 %v844_v26 }
  0x63   : > { %730 = vmatprep.subr.bf16.mxu1 %v1002_v20 }
  0x64   : > { %402 = vmatmul.mubr.bf16.vlgmr.msra.gmra.mxu0 %v837_v18 }
  0x66   : > { %731 = vmatpush3.bf16.msra.mxu1 %v845_v27 }
 0x124   : > { %v403_v28 = vpop.f32.mrf.mxu0 }
 0x125   : > { %v690_v29 = vmul.f32 -1.442695, %v403_v28 }
 0x126   : > { %v405_v30 = vpop.f32.mrf.mxu0 }
 0x127   : > { %846 = vpow2.f32 %v690_v29 }
 0x128   : > { %v407_v31 = vpop.f32.mrf.mxu0 }
 0x129   : > { %v691_v32 = vmul.f32 -1.442695, %v407_v31 }
 0x12a   : > { %v409_v41 = vpop.f32.mrf.mxu0 }
 0x12b   : > { %848 = vpow2.f32 %v691_v32 }
 0x134   : > { %v847_v33 = vpop.eup %846 }
 0x135   : > { %v418_v34 = vadd.f32 1.0, %v847_v33 }
 0x137   : > { %850 = vrcp.f32 %v418_v34 }
 0x138   : > { %v849_v35 = vpop.eup %848 }
 0x139   : > { %v419_v36 = vadd.f32 1.0, %v849_v35 }
 0x13b   : > { %852 = vrcp.f32 %v419_v36 }
 0x144   : > { %v851_v37 = vpop.eup %850 }
 0x145   : > { %v424_v38 = vmul.f32 %v851_v37, %v403_v28 }
 0x147   : > { %v426_v42 = vmul.f32 %v424_v38, %v405_v30 }
 0x148   : > { %v853_v39 = vpop.eup %852 }
 0x149   : > { %v425_v40 = vmul.f32 %v853_v39, %v407_v31 }
 0x14b   : > { %v427_v43 = vmul.f32 %v425_v40, %v409_v41 }
 0x14d   : > { %v430_v44 = vpack.c.bf16 %v427_v43, %v426_v42 }
 0x14f   : > { %733 = vmatmul.mubr.bf16.vlgmr.msra.gmra.mxu1 %v430_v44 }
 0x20f   : > { %v529_v46 = vpop.f32.mrf.mxu1 }
 0x210   : > { %v536_v47 = vadd.f32 %v529_v46, %v428_v45 }
 0x211   : > { %v734_v48 = vpop.f32.mrf.mxu1 }
 0x212   : > { %538 = vst [vmem:[#allocation2] sm:$0xff] %v536_v47  ;;  %543 = sbr.rel (%p700_p7) target bundleno = 543 (0x21f), region = 48 }
 0x213   : > { %v532_v50 = vpop.f32.mrf.mxu1 }
 0x214   : > { %v537_v51 = vadd.f32 %v532_v50, %v429_v49 }
 0x215   : > { %v735_v52 = vpop.f32.mrf.mxu1 }
 0x216   : > { %539 = vst [vmem:[#allocation2 + $0x8] sm:$0xff] %v537_v51 }
 0x219   : > { %v544_v53 = vld [vmem:[#allocation2] sm:$0xff] }
 0x21a   : > { %546 = vst [vmem:[#allocation8] sm:$0xff] %v544_v53 }
 0x21d   : > { %v545_v54 = vld [vmem:[#allocation2 + $0x8] sm:$0xff] }
 0x21e   : > { %547 = vst [vmem:[#allocation8 + $0x8] sm:$0xff] %v545_v54 }
 0x21f PF: > { %p1165_p10 = scmp.eq.s32.totalorder %s659_s18, 2  ;;  %s1004_s4 = smov [#allocation8]  }
 0x220   : > { %s557_s8 = sshll.u32 %s1004_s4, 4  ;;  %s558_s8 = int_to_ptr.vmem [resolvable:$true] %s557_s8 }
 0x221   : > { %s910_s9 = scalar_lea.vmem %s558_s8, 256  ;;  %p917_p6 = scmp.lt.s32.totalorder %s558_s8, %s558_s8 }
 0x222   : > { %p911_p3 = scmp.ne.s32.totalorder %s558_s8, %s910_s9  ;;  %p918_p8 = scmp.lt.s32.totalorder %s910_s9, %s910_s9 }
 0x224   : > { %p912_p4 = pnand %p911_p3, %p1165_p10  ;;  %p919_p11 = por %p918_p8, %p917_p6 }
 0x226   : > { %p913_p5 = pneg %p912_p4 }
 0x228   : > { %p920_p12 = pnand %p919_p11, %p913_p5 }
 0x22a   : > { %923 = shalt.err (!%p920_p12)
}
 0x22b   : > { %s1005_s15 = smov 128   ;;  %s1006_s18 = smov 8  }
 0x22c   : > { %741 = dma.vmem_to_hbm [thread:$0]  (%p1165_p10), %s558_s8, 256, %s1201_s3, [#allocation5], %s1005_s15, %s1005_s15, %s1006_s18  }
 0x22d   : > { %967 = dma.done.wait (%p1165_p10), [#allocation5], 256  }
 0x22e   : > { %969 = vsyncadd (%p1165_p10), [#allocation5], 4294967040 }
 0x22f PF: > { %s20_s17 = sadd.s32 1, %s992_s17   ;;  %s1207_s12 = smov %s976_s13 }
 0x230   : > { %p17_p13 = scmp.ge.s32.totalorder %s20_s17, 5   ;;  %s1208_s13 = smov %s980_s14 }
 0x231   : > { %s1209_s14 = smov %s1078_s24  ;;  %s1210_s15 = smov %s988_s16 }
 0x232   : > { %s1211_s16 = smov %s1213_s19  ;;  %19 = sbr.rel (!%p17_p13) target bundleno = 7 (0x7), region = 94 }
 0x237   :  { %573 = vsyncpa [#allocation4], 1 }
 0x238   :  { %575 = vsyncpa [#allocation4 + $0x1], 1 }
 0x239   :  { %576 = vsyncpa [#allocation7], 1 }
 0x23a   :  { %578 = vsyncpa [#allocation7 + $0x1], 1 }
 0x23b   :  { %579 = vsyncpa [#allocation5], 1 }
 0x23c   :  { %581 = vsyncpa [#allocation5 + $0x1], 1 }

</bundles_post_ra>
